<compile_context>
chip_gen: v7x
topology: tpu7x:2x2x1
jax: 0.10.0
libtpu: 0.0.40
codegen_flags: <defaults>
</compile_context>

<pallas_src>
import jax
import jax.numpy as jnp
from jax.experimental import pallas as pl
from jax.experimental.pallas import tpu as pltpu


def _smooth_condition_kernel(lens_ref, tc_ref, x_ref, w1_ref, b1_ref, w2_ref, out_ref):
    NB, T, C = x_ref.shape
    A = w1_ref.shape[1]

    xd = x_ref[...]                                   # native dtype; no full-tile upcast

    # ---- MaskedAttention hidden layer: one (NB*T, C) @ (C, A) MXU matmul for the
    # whole block (T % 8 == 0 -> the reshape is a free major-dim re-tiling).
    h = jnp.tanh(
        jnp.dot(xd.reshape(NB * T, C), w1_ref[...],
                preferred_element_type=jnp.float32) + b1_ref[...]
    ).reshape(NB, T, A)                               # (NB, T, A) f32

    # ---- Second projection (A -> 1) as a lane reduction (VPU/XLU); logits come
    # out lane-major (NB, T). b2 omitted: softmax is shift-invariant.
    s = jnp.sum(h * w2_ref[...][None, :, :], axis=-1)             # (NB, T) f32

    # ---- Per-row scalars: single vectorized (NB, 1) loads (no unrolled gather).
    lens_v = lens_ref[...]                                        # (NB, 1) int32
    tc_v = tc_ref[...]                                            # (NB, 1) int32

    # ---- Length-masked softmax over the time axis (lanes).
    pos = jax.lax.broadcasted_iota(jnp.int32, (NB, T), 1)
    s = jnp.where(pos < lens_v, s, jnp.float32(-1e9))
    m = jnp.max(s, axis=-1, keepdims=True)                        # (NB, 1)
    e = jnp.exp(s - m)
    score = e / jnp.sum(e, axis=-1, keepdims=True)                # (NB, T) f32

    # ---- Scatter score into column target_codes[b], add, clip(max=1).
    # Kept in x's dtype: no full-tile f32 temporary of the (NB, T, C) block.
    col = jax.lax.broadcasted_iota(jnp.int32, (NB, 1, C), 2)
    hit = col == tc_v[:, :, None]                                 # (NB, 1, C)
    score_x = score.astype(xd.dtype)
    add = jnp.where(hit, score_x[:, :, None], jnp.zeros((), xd.dtype))   # (NB, T, C)
    out_ref[...] = jnp.minimum(xd + add, jnp.asarray(1.0, xd.dtype))


def _tpu_vmem_and_cores():
    """Per-generation physical VMEM (bytes) and TensorCore count, best effort."""
    phys = 128 << 20                     # v5e / v6e physical VMEM per TensorCore
    cores = 0
    try:
        info = pltpu.get_tpu_info()
        phys = int(getattr(info, "vmem_capacity_bytes", phys) or phys)
        for name in ("num_tensorcores", "tensorcore_count", "num_cores", "core_count"):
            v = getattr(info, name, None)
            if v:
                cores = int(v)
                break
    except Exception:                    # query unavailable: conservative defaults
        pass
    if not cores:
        # v7x exposes 64 MiB of VMEM per TensorCore and has 2 TCs per chip.
        cores = 2 if phys <= (64 << 20) else 1
    return phys, cores


def _choose_block_b(B, T, C, A, itemsize, vmem_budget, num_cores):
    """Batch-block size for an HBM-bandwidth-bound kernel.

    The kernel moves ~2*T*C*itemsize HBM bytes per batch row (read x, write out)
    at only ~A/4 FLOPs/byte, so the MXU never limits: size the block for DMA
    efficiency (a few MiB per step) and VMEM fit, not MXU M-fill.
    """
    row_bytes = T * C * itemsize                         # one batch row of x
    # VMEM per batch row: double-buffered x + double-buffered out
    # + ~2 f32 full-tile temporaries (scatter/add path) + f32 hidden activations.
    per_row_vmem = 4 * row_bytes + 2 * T * C * 4 + T * A * 4
    fixed_vmem = 2 * C * A * 4 + (2 << 20)               # W1 double buffer + slack

    target_nb = max(1, (4 << 20) // row_bytes)           # ~4 MiB of x per grid step
    vmem_nb = max(1, (vmem_budget - fixed_vmem) // per_row_vmem)
    nb = max(1, min(B, target_nb, vmem_nb))

    # Multi-TensorCore chips (v7x): prefer >= 4 grid steps per core for load
    # balance, but never shrink the x block below ~1 MiB. Single-TC chips
    # (v5e/v6e) skip this entirely — shrinking the tile there is a pure loss.
    if num_cores > 1 and B > 1:
        floor_nb = max(1, (1 << 20) // row_bytes)
        while nb > floor_nb and pl.cdiv(B, nb) < 4 * num_cores:
            nb = max(floor_nb, nb // 2)

    # Keep the (nb, 1) lens/target blocks tiling-friendly: nb == B or nb % 8 == 0.
    if nb >= B:
        return B
    nb = max(8, (nb // 8) * 8)
    return B if nb >= B else nb


def smooth_condition(x, lens, target_codes, w1, b1, w2, b2=None, *, block_b=None):
    """Pallas forward pass of SmoothCondition.

    x: (B, T, C) activations; lens: (B,) valid lengths; target_codes: (B,) code ids.
    w1: (C, A), b1: (1, A), w2: (A, 1), b2: (1, 1) (b2 unused: softmax shift-invariant).
    """
    B, T, C = x.shape
    Cw, A = w1.shape
    assert Cw == C, "w1 must be (code_num, attention_dim)"
    assert T % 8 == 0, "seq_len should be a multiple of 8 (sublane tile)"

    # Lane-dense stores: pad code_num to a multiple of 128 so (nb, T, C) stores
    # are unmasked `vst` (prefer C % 128 == 0 upstream; this pad costs an extra
    # HBM pass over x when it triggers).
    Ck = pl.cdiv(C, 128) * 128
    if Ck != C:
        x = jnp.pad(x, ((0, 0), (0, 0), (0, Ck - C)))
        w1 = jnp.pad(w1, ((0, Ck - C), (0, 0)))

    itemsize = jnp.dtype(x.dtype).itemsize
    phys_vmem, cores = _tpu_vmem_and_cores()
    budget = int(phys_vmem * 0.7)                        # working budget inside the scoped limit
    nb = block_b if block_b is not None else _choose_block_b(
        B, T, Ck, A, itemsize, budget, cores)

    # Raise the scoped-VMEM limit to cover the chosen block with headroom
    # (defaults are only 16/32/32 MiB on v5e/v6e/v7x).
    per_row_vmem = 4 * T * Ck * itemsize + 2 * T * Ck * 4 + T * A * 4
    needed = nb * per_row_vmem + 2 * Ck * A * 4 + (2 << 20)
    vmem_limit = int(min(phys_vmem * 9 // 10, max(needed + (4 << 20), 32 << 20)))

    lens2d = lens.astype(jnp.int32).reshape(B, 1)
    tc2d = target_codes.astype(jnp.int32).reshape(B, 1)
    w1c = w1.astype(x.dtype)                             # MXU-native (bf16 stays bf16)
    b1_row = b1.reshape(1, A).astype(jnp.float32)
    w2_row = w2.reshape(1, A).astype(jnp.float32)        # (A, 1) -> (1, A): lane reduce
    # b2 intentionally not forwarded to the kernel (softmax shift-invariance).

    grid = (pl.cdiv(B, nb),)                             # ragged last block handled by Pallas

    out = pl.pallas_call(
        _smooth_condition_kernel,
        out_shape=jax.ShapeDtypeStruct((B, T, Ck), x.dtype),
        grid=grid,
        in_specs=[
            pl.BlockSpec((nb, 1), lambda i: (i, 0)),          # lens
            pl.BlockSpec((nb, 1), lambda i: (i, 0)),          # target_codes
            pl.BlockSpec((nb, T, Ck), lambda i: (i, 0, 0)),   # x
            pl.BlockSpec((Ck, A), lambda i: (0, 0)),          # W1
            pl.BlockSpec((1, A), lambda i: (0, 0)),           # b1 row
            pl.BlockSpec((1, A), lambda i: (0, 0)),           # W2 row
        ],
        out_specs=pl.BlockSpec((nb, T, Ck), lambda i: (i, 0, 0)),
        compiler_params=pltpu.CompilerParams(
            dimension_semantics=("parallel",),
            vmem_limit_bytes=vmem_limit,
        ),
    )(lens2d, tc2d, x, w1c, b1_row, w2_row)

    return out if Ck == C else out[..., :C]


def _reference(x, lens, target_codes, w1, b1, w2, b2):
    # Pure-JAX reference of the same forward pass (keeps b2 to prove equivalence).
    h = jnp.tanh(x @ w1 + b1.reshape(1, 1, -1))          # (B, T, A)
    s = (h @ w2)[..., 0] + b2[0, 0]                      # (B, T)
    pos = jnp.arange(x.shape[1])[None, :]
    s = jnp.where(pos < lens[:, None], s, -1e9)
    score = jax.nn.softmax(s, axis=-1)                   # (B, T)
    col = jnp.arange(x.shape[2])[None, None, :]
    add = jnp.where(col == target_codes[:, None, None], score[:, :, None], 0.0)
    return jnp.minimum(x + add, 1.0)


if __name__ == "__main__":
    B, T = 4, 16          # batch, seq_len
    C = 128               # code_num (multiple of 128 -> lane-dense loads/stores)
    A = 64                # attention_dim

    key = jax.random.PRNGKey(0)
    kx, kw1, kb1, kw2, kb2 = jax.random.split(key, 5)

    x = jax.random.uniform(kx, (B, T, C), dtype=jnp.float32)
    lens = jnp.array([16, 9, 5, 1], dtype=jnp.int32)
    target_codes = jnp.array([3, 100, 64, 0], dtype=jnp.int32)

    # Deterministic parameter init (Linear(C->A), Linear(A->1)).
    w1 = jax.random.normal(kw1, (C, A), dtype=jnp.float32) * 0.1
    b1 = jax.random.normal(kb1, (1, A), dtype=jnp.float32) * 0.1
    w2 = jax.random.normal(kw2, (A, 1), dtype=jnp.float32) * 0.1
    b2 = jax.random.normal(kb2, (1, 1), dtype=jnp.float32) * 0.1

    out = smooth_condition(x, lens, target_codes, w1, b1, w2, b2)
    out = jax.block_until_ready(out)

    ref = _reference(x, lens, target_codes, w1, b1, w2, b2)
    assert out.shape == (B, T, C)
    assert jnp.allclose(out, ref, atol=1e-5, rtol=1e-5), float(jnp.max(jnp.abs(out - ref)))

    print("KERNEL_OK")
</pallas_src>

<mosaic_0001>
module attributes {stable_mosaic.version = 11 : i64} {
  func.func @_smooth_condition_kernel(%arg0: i32, %arg1: memref<4x1xi32, #tpu.memory_space<vmem>>, %arg2: memref<4x1xi32, #tpu.memory_space<vmem>>, %arg3: memref<4x16x128xf32, #tpu.memory_space<vmem>>, %arg4: memref<128x64xf32, #tpu.memory_space<vmem>>, %arg5: memref<1x64xf32, #tpu.memory_space<vmem>>, %arg6: memref<1x64xf32, #tpu.memory_space<vmem>>, %arg7: memref<4x16x128xf32, #tpu.memory_space<vmem>>) attributes {dimension_semantics = [#tpu.dimension_semantics<parallel>], iteration_bounds = array<i64: 1>, scalar_prefetch = 0 : i64, scratch_operands = 0 : i64, tpu.core_type = #tpu.core_type<tc>, window_params = [{transform_indices = @transform_0, window_bounds = array<i64: 4, 1>}, {transform_indices = @transform_1, window_bounds = array<i64: 4, 1>}, {transform_indices = @transform_2, window_bounds = array<i64: 4, 16, 128>}, {pipeline_mode = #tpu.pipeline_mode<synchronous>, transform_indices = @transform_3, window_bounds = array<i64: 128, 64>}, {pipeline_mode = #tpu.pipeline_mode<synchronous>, transform_indices = @transform_4, window_bounds = array<i64: 1, 64>}, {pipeline_mode = #tpu.pipeline_mode<synchronous>, transform_indices = @transform_5, window_bounds = array<i64: 1, 64>}, {transform_indices = @transform_6, window_bounds = array<i64: 4, 16, 128>}]} {
    %c0 = arith.constant 0 : index
    %c0_0 = arith.constant 0 : index
    %c0_1 = arith.constant 0 : index
    %0 = vector.load %arg3[%c0, %c0_0, %c0_1] : memref<4x16x128xf32, #tpu.memory_space<vmem>>, vector<4x16x128xf32>
    %1 = vector.shape_cast %0 : vector<4x16x128xf32> to vector<64x128xf32>
    %c0_2 = arith.constant 0 : index
    %c0_3 = arith.constant 0 : index
    %2 = vector.load %arg4[%c0_2, %c0_3] : memref<128x64xf32, #tpu.memory_space<vmem>>, vector<128x64xf32>
    %cst = arith.constant dense<0.000000e+00> : vector<64x64xf32>
    %3 = tpu.matmul %1, %2, %cst {dimension_numbers = #tpu.dot_dimension_numbers<[1], [0], [0], [1], [0, 0, 1, 1], [], []>} : vector<64x128xf32>, vector<128x64xf32>, vector<64x64xf32> -> vector<64x64xf32>
    %c0_4 = arith.constant 0 : index
    %c0_5 = arith.constant 0 : index
    %4 = vector.load %arg5[%c0_4, %c0_5] : memref<1x64xf32, #tpu.memory_space<vmem>>, vector<1x64xf32>
    %5 = vector.broadcast %4 : vector<1x64xf32> to vector<64x64xf32>
    %6 = arith.addf %3, %5 : vector<64x64xf32>
    %7 = math.tanh %6 : vector<64x64xf32>
    %8 = vector.shape_cast %7 : vector<64x64xf32> to vector<4x16x64xf32>
    %c0_6 = arith.constant 0 : index
    %c0_7 = arith.constant 0 : index
    %9 = vector.load %arg6[%c0_6, %c0_7] : memref<1x64xf32, #tpu.memory_space<vmem>>, vector<1x64xf32>
    %10 = vector.shape_cast %9 : vector<1x64xf32> to vector<1x1x64xf32>
    %11 = vector.broadcast %10 : vector<1x1x64xf32> to vector<4x16x64xf32>
    %12 = arith.mulf %8, %11 : vector<4x16x64xf32>
    %cst_8 = arith.constant dense<0.000000e+00> : vector<4x16xf32>
    %13 = vector.multi_reduction <add>, %12, %cst_8 [2] : vector<4x16x64xf32> to vector<4x16xf32>
    %c0_9 = arith.constant 0 : index
    %c0_10 = arith.constant 0 : index
    %14 = vector.load %arg1[%c0_9, %c0_10] : memref<4x1xi32, #tpu.memory_space<vmem>>, vector<4x1xi32>
    %c0_11 = arith.constant 0 : index
    %c0_12 = arith.constant 0 : index
    %15 = vector.load %arg2[%c0_11, %c0_12] : memref<4x1xi32, #tpu.memory_space<vmem>>, vector<4x1xi32>
    %16 = tpu.iota {dimensions = array<i32: 1>} : vector<4x16xi32>
    %17 = vector.broadcast %14 : vector<4x1xi32> to vector<4x16xi32>
    %18 = arith.cmpi slt, %16, %17 : vector<4x16xi32>
    %cst_13 = arith.constant -1.000000e+09 : f32
    %19 = vector.broadcast %cst_13 : f32 to vector<4x16xf32>
    %20 = arith.select %18, %13, %19 : vector<4x16xi1>, vector<4x16xf32>
    %cst_14 = arith.constant dense<0xFF800000> : vector<4xf32>
    %21 = vector.multi_reduction <maximumf>, %20, %cst_14 [1] : vector<4x16xf32> to vector<4xf32>
    %22 = vector.shape_cast %21 : vector<4xf32> to vector<4x1xf32>
    %23 = vector.broadcast %22 : vector<4x1xf32> to vector<4x16xf32>
    %24 = arith.subf %20, %23 : vector<4x16xf32>
    %25 = math.exp %24 : vector<4x16xf32>
    %cst_15 = arith.constant dense<0.000000e+00> : vector<4xf32>
    %26 = vector.multi_reduction <add>, %25, %cst_15 [1] : vector<4x16xf32> to vector<4xf32>
    %27 = vector.shape_cast %26 : vector<4xf32> to vector<4x1xf32>
    %28 = vector.broadcast %27 : vector<4x1xf32> to vector<4x16xf32>
    %29 = arith.divf %25, %28 : vector<4x16xf32>
    %30 = tpu.iota {dimensions = array<i32: 2>} : vector<4x1x128xi32>
    %31 = vector.shape_cast %15 : vector<4x1xi32> to vector<4x1x1xi32>
    %32 = vector.broadcast %31 : vector<4x1x1xi32> to vector<4x1x128xi32>
    %33 = arith.cmpi eq, %30, %32 : vector<4x1x128xi32>
    %34 = vector.shape_cast %29 : vector<4x16xf32> to vector<4x16x1xf32>
    %cst_16 = arith.constant 0.000000e+00 : f32
    %35 = vector.shape_cast %33 : vector<4x1x128xi1> to vector<4x1x128xi1>
    %36 = vector.broadcast %35 : vector<4x1x128xi1> to vector<4x16x128xi1>
    %37 = vector.shape_cast %34 : vector<4x16x1xf32> to vector<4x16x1xf32>
    %38 = vector.broadcast %37 : vector<4x16x1xf32> to vector<4x16x128xf32>
    %39 = vector.broadcast %cst_16 : f32 to vector<4x16x128xf32>
    %40 = arith.select %36, %38, %39 : vector<4x16x128xi1>, vector<4x16x128xf32>
    %41 = arith.addf %0, %40 : vector<4x16x128xf32>
    %cst_17 = arith.constant 1.000000e+00 : f32
    %42 = vector.broadcast %cst_17 : f32 to vector<4x16x128xf32>
    %43 = arith.minimumf %41, %42 : vector<4x16x128xf32>
    %c0_18 = arith.constant 0 : index
    %c0_19 = arith.constant 0 : index
    %c0_20 = arith.constant 0 : index
    %44 = vector.load %arg7[%c0_18, %c0_19, %c0_20] : memref<4x16x128xf32, #tpu.memory_space<vmem>>, vector<4x16x128xf32>
    tpu.vector_store %arg7[%c0_18, %c0_19, %c0_20], %43 {strides = array<i32>} : memref<4x16x128xf32, #tpu.memory_space<vmem>>, vector<4x16x128xf32>,
    return
  }
  func.func @transform_0(%arg0: i32) -> (i32, i32) {
    %c0_i32 = arith.constant 0 : i32
    %c0_i32_0 = arith.constant 0 : i32
    return %arg0, %c0_i32 : i32, i32
  }
  func.func @transform_1(%arg0: i32) -> (i32, i32) {
    %c0_i32 = arith.constant 0 : i32
    %c0_i32_0 = arith.constant 0 : i32
    return %arg0, %c0_i32 : i32, i32
  }
  func.func @transform_2(%arg0: i32) -> (i32, i32, i32) {
    %c0_i32 = arith.constant 0 : i32
    %c0_i32_0 = arith.constant 0 : i32
    %c0_i32_1 = arith.constant 0 : i32
    return %arg0, %c0_i32, %c0_i32_0 : i32, i32, i32
  }
  func.func @transform_3(%arg0: i32) -> (i32, i32) {
    %c0_i32 = arith.constant 0 : i32
    %c0_i32_0 = arith.constant 0 : i32
    %c0_i32_1 = arith.constant 0 : i32
    return %c0_i32, %c0_i32_0 : i32, i32
  }
  func.func @transform_4(%arg0: i32) -> (i32, i32) {
    %c0_i32 = arith.constant 0 : i32
    %c0_i32_0 = arith.constant 0 : i32
    %c0_i32_1 = arith.constant 0 : i32
    return %c0_i32, %c0_i32_0 : i32, i32
  }
  func.func @transform_5(%arg0: i32) -> (i32, i32) {
    %c0_i32 = arith.constant 0 : i32
    %c0_i32_0 = arith.constant 0 : i32
    %c0_i32_1 = arith.constant 0 : i32
    return %c0_i32, %c0_i32_0 : i32, i32
  }
  func.func @transform_6(%arg0: i32) -> (i32, i32, i32) {
    %c0_i32 = arith.constant 0 : i32
    %c0_i32_0 = arith.constant 0 : i32
    %c0_i32_1 = arith.constant 0 : i32
    return %arg0, %c0_i32, %c0_i32_0 : i32, i32, i32
  }
}

</mosaic_0001>

<bundles_post_ra>
// kernel: tpu_custom_call.1
= control target key start
LH: loop header
LB: loop body
LE: loop exit
PB: predicated region body
PF: predicated region fallthrough
CT: control target
= control target key end

     0   :  { %s834_s0 = inlined_call_operand.vmem [shape: s32[4,1], index: 0, kind: input, shape index: {}]   ;;  %s835_s1 = inlined_call_operand.vmem [shape: s32[4,1], index: 1, kind: input, shape index: {}]   ;;  %s836_s2 = inlined_call_operand.vmem [shape: f32[4,16,128], index: 2, kind: input, shape index: {}]   ;;  %s837_s3 = inlined_call_operand.vmem [shape: f32[128,64], index: 3, kind: input, shape index: {}]   ;;  %s838_s4 = inlined_call_operand.vmem [shape: f32[1,64], index: 4, kind: input, shape index: {}]   ;;  %s839_s5 = inlined_call_operand.vmem [shape: f32[1,64], index: 5, kind: input, shape index: {}]   ;;  %s840_s6 = inlined_call_operand.hbm [shape: f32[4,16,128], index: 6, kind: output, shape index: {}]  }
   0x1   :  { %v32_v0 = vld [vmem:[%s837_s3] sm:$0xff]  ;;  %v33_v1 = vld [vmem:[%s837_s3 + $0x8] sm:$0xff]  ;;  %v34_v2 = vld [vmem:[%s837_s3 + $0x10] sm:$0xff] }
   0x2   :  { %v509_v3 = vpack.c.bf16 %v33_v1, %v32_v0  ;;  %v35_v4 = vld [vmem:[%s837_s3 + $0x18] sm:$0xff]  ;;  %v36_v6 = vld [vmem:[%s837_s3 + $0x20] sm:$0xff]  ;;  %v37_v7 = vld [vmem:[%s837_s3 + $0x28] sm:$0xff] }
   0x3   :  { %v513_v5 = vpack.c.bf16 %v35_v4, %v34_v2  ;;  %v517_v8 = vpack.c.bf16 %v37_v7, %v36_v6  ;;  %v669_v9 = vld [vmem:[%s836_s2] sm:$0xff]  ;;  %v38_v11 = vld [vmem:[%s837_s3 + $0x30] sm:$0xff]  ;;  %v39_v12 = vld [vmem:[%s837_s3 + $0x38] sm:$0xff] }
   0x4   :  { %510 = vmatprep.subr.bf16.mxu0 %v509_v3  ;;  %541 = vmatprep.subr.bf16.mxu1 %v509_v3  ;;  %v674_v10 = vld [vmem:[%s836_s2 + $0x20] sm:$0xff] }
   0x5   :  { %512 = vmatpush3.bf16.msra.mxu0 %v509_v3  ;;  %549 = vmatpush3.bf16.msra.mxu1 %v509_v3 }
   0x6   :  { %514 = vmatprep.subr.bf16.mxu0 %v513_v5  ;;  %542 = vmatprep.subr.bf16.mxu1 %v513_v5 }
   0x7   :  { %497 = vmatprep.mubr.f32.mxu0 %v669_v9  ;;  %503 = vmatprep.mubr.f32.mxu1 %v674_v10 }
   0x9   :  { %516 = vmatpush3.bf16.msra.mxu0 %v513_v5  ;;  %550 = vmatpush3.bf16.msra.mxu1 %v513_v5 }
   0xa   :  { %11 = vsyncpa [#allocation3], 0  ;;  %518 = vmatprep.subr.bf16.mxu0 %v517_v8  ;;  %543 = vmatprep.subr.bf16.mxu1 %v517_v8  ;;  %v521_v13 = vpack.c.bf16 %v39_v12, %v38_v11  ;;  %v40_v14 = vld [vmem:[%s837_s3 + $0x40] sm:$0xff]  ;;  %v41_v15 = vld [vmem:[%s837_s3 + $0x48] sm:$0xff]  ;;  %v608_v32 = vmov 0   ;;  %vm183_vm0 = vcmask 523264  }
   0xb   :  { %v525_v16 = vpack.c.bf16 %v41_v15, %v40_v14  ;;  %v42_v17 = vld [vmem:[%s837_s3 + $0x50] sm:$0xff]  ;;  %v43_v18 = vld [vmem:[%s837_s3 + $0x58] sm:$0xff]  ;;  %v44_v20 = vld [vmem:[%s837_s3 + $0x60] sm:$0xff]  ;;  %562 = vset.pattern.permute.xlu0 %v608_v32  ;;  %563 = vset.pattern.permute.xlu1 %v608_v32  ;;  %v210_v14 = vlaneseq  ;;  %vm233_vm1 = vcmask 130112   ;;  %vm262_vm2 = vcmask 1041409  }
   0xc   :  { %v529_v19 = vpack.c.bf16 %v43_v18, %v42_v17  ;;  %v45_v21 = vld [vmem:[%s837_s3 + $0x68] sm:$0xff]  ;;  %v46_v23 = vld [vmem:[%s837_s3 + $0x70] sm:$0xff]  ;;  %v47_v24 = vld [vmem:[%s837_s3 + $0x78] sm:$0xff]  ;;  %vm264_vm3 = vcmask 1042434   ;;  %vm266_vm4 = vcmask 1043459   ;;  %vm270_vm5 = vcmask 125952  }
   0xd   :  { %520 = vmatpush3.bf16.msra.mxu0 %v517_v8  ;;  %551 = vmatpush3.bf16.msra.mxu1 %v517_v8  ;;  %v533_v22 = vpack.c.bf16 %v45_v21, %v44_v20  ;;  %v537_v25 = vpack.c.bf16 %v47_v24, %v46_v23  ;;  %v711_v26 = vld [vmem:[%s836_s2 + $0x8] sm:$0xff]  ;;  %v721_v28 = vld [vmem:[%s836_s2 + $0x10] sm:$0xff]  ;;  %v734_v30 = vld [vmem:[%s836_s2 + $0x18] sm:$0xff]  ;;  %v761_v15 = vand.u32 127, %v210_v14  ;;  %v763_v18 = vshrl.u32 %v210_v14, 7 }
   0xe   :  { %522 = vmatprep.subr.bf16.mxu0 %v521_v13  ;;  %544 = vmatprep.subr.bf16.mxu1 %v521_v13  ;;  %v716_v27 = vld [vmem:[%s836_s2 + $0x28] sm:$0xff]  ;;  %v726_v29 = vld [vmem:[%s836_s2 + $0x30] sm:$0xff]  ;;  %v740_v31 = vld [vmem:[%s836_s2 + $0x38] sm:$0xff] }
   0xf   :  { %v438_v33 = vld [vmem:[%s838_s4] ss:$0 sm:$0xff]  ;;  %v226_v23 = vsub.s32 %v761_v15, %v763_v18  ;;  %v373_v14 = vsub.s32 3, %v763_v18 }
  0x10   :  { %v439_v50 = vld [vmem:[%s839_s5] ss:$0 sm:$0xff] }
  0x11   :  { %524 = vmatpush3.bf16.msra.mxu0 %v521_v13  ;;  %552 = vmatpush3.bf16.msra.mxu1 %v521_v13  ;;  %v208_v13 = vld [vmem:[%s834_s0] sm:$0xf] }
  0x12   :  { %526 = vmatprep.subr.bf16.mxu0 %v525_v16  ;;  %545 = vmatprep.subr.bf16.mxu1 %v525_v16 }
  0x15   :  { %528 = vmatpush3.bf16.msra.mxu0 %v525_v16  ;;  %553 = vmatpush3.bf16.msra.mxu1 %v525_v16 }
  0x16   :  { %530 = vmatprep.subr.bf16.mxu0 %v529_v19  ;;  %546 = vmatprep.subr.bf16.mxu1 %v529_v19 }
  0x19   :  { %532 = vmatpush3.bf16.msra.mxu0 %v529_v19  ;;  %554 = vmatpush3.bf16.msra.mxu1 %v529_v19  ;;  %v228_v19 = vadd.s32 4294967288, %v761_v15 }
  0x1a   :  { %534 = vmatprep.subr.bf16.mxu0 %v533_v22  ;;  %547 = vmatprep.subr.bf16.mxu1 %v533_v22 }
  0x1d   :  { %536 = vmatpush3.bf16.msra.mxu0 %v533_v22  ;;  %555 = vmatpush3.bf16.msra.mxu1 %v533_v22  ;;  %v231_v22 = vsub.s32 %v228_v19, %v763_v18 }
  0x1e   :  { %538 = vmatprep.subr.bf16.mxu0 %v537_v25  ;;  %548 = vmatprep.subr.bf16.mxu1 %v537_v25 }
  0x21   :  { %540 = vmatpush3.bf16.msra.mxu0 %v537_v25  ;;  %556 = vmatpush3.bf16.msra.mxu1 %v537_v25 }
  0x24   :  { %498 = vmatmul.mubr.f32.vlgmr.msra.gmra.mrb[0].mxu0 %v711_v26  ;;  %504 = vmatmul.mubr.f32.vlgmr.msra.gmra.mrb[0].mxu1 %v716_v27 }
  0x25   :  { %500 = vmatprep.mubr.f32.mxu0 %v721_v28  ;;  %506 = vmatprep.mubr.f32.mxu1 %v726_v29 }
  0x28   :  { %501 = vmatmul.mubr.f32.gmra.mrb[2].mxu0 %v734_v30  ;;  %507 = vmatmul.mubr.f32.gmra.mrb[2].mxu1 %v740_v31 }
  0xf7   :  { %v499_v34 = vpop.f32.mrb[0].mxu0  ;;  %v505_v35 = vpop.f32.mrb[0].mxu1 }
  0xf8   :  { %v127_v36 = vadd.f32 %v499_v34, %v438_v33  ;;  %v147_v37 = vadd.f32 %v505_v35, %v438_v33  ;;  %v121_v38 = vpop.f32.mrb[1].mxu0  ;;  %v141_v39 = vpop.f32.mrb[1].mxu1 }
  0xf9   :  { %v122_v40 = vadd.f32 %v438_v33, %v121_v38  ;;  %v142_v41 = vadd.f32 %v438_v33, %v141_v39 }
  0xfa   :  { %564 = vtanh.f32 %v127_v36 }
  0xfb   :  { %566 = vtanh.f32 %v147_v37  ;;  %v502_v42 = vpop.f32.mrb[2].mxu0  ;;  %v508_v43 = vpop.f32.mrb[2].mxu1 }
  0xfc   :  { %568 = vtanh.f32 %v122_v40  ;;  %v137_v44 = vadd.f32 %v502_v42, %v438_v33  ;;  %v131_v45 = vpop.f32.mrb[3].mxu0  ;;  %v157_v46 = vadd.f32 %v508_v43, %v438_v33  ;;  %v151_v47 = vpop.f32.mrb[3].mxu1 }
  0xfd   :  { %570 = vtanh.f32 %v142_v41  ;;  %v132_v48 = vadd.f32 %v438_v33, %v131_v45  ;;  %v152_v49 = vadd.f32 %v438_v33, %v151_v47 }
  0xfe   :  { %572 = vtanh.f32 %v137_v44 }
  0xff   :  { %574 = vtanh.f32 %v132_v48 }
 0x100   :  { %576 = vtanh.f32 %v157_v46 }
 0x101   :  { %578 = vtanh.f32 %v152_v49 }
 0x104   :  { %v565_v51 = vpop.eup %564 }
 0x105   :  { %v567_v52 = vpop.eup %566  ;;  %v176_v53 = vmul.f32 %v565_v51, %v439_v50 }
 0x106   :  { %v569_v54 = vpop.eup %568  ;;  %v180_v55 = vmul.f32 %v567_v52, %v439_v50 }
 0x107   :  { %v571_v56 = vpop.eup %570  ;;  %v187_v57 = vsel %vm183_vm0, %v176_v53, 0.0  ;;  %v175_v58 = vmul.f32 %v569_v54, %v439_v50 }
 0x108   :  { %v573_v59 = vpop.eup %572  ;;  %v199_v60 = vsel %vm183_vm0, %v180_v55, 0.0  ;;  %188 = vadd.xlane.f32.xlu0 %v187_v57  ;;  %v179_v4 = vmul.f32 %v571_v56, %v439_v50  ;;  %v609_v57 = vmov 1966171168  }
 0x109   :  { %v575_v61 = vpop.eup %574  ;;  %200 = vadd.xlane.f32.xlu1 %v199_v60  ;;  %v178_v62 = vmul.f32 %v573_v59, %v439_v50  ;;  %v184_v3 = vsel %vm183_vm0, %v175_v58, 0.0  ;;  %v291_v58 = vunpack.c.l.s4 %v609_v57 }
 0x10a   :  { %v577_v63 = vpop.eup %576  ;;  %v177_v0 = vmul.f32 %v575_v61, %v439_v50  ;;  %v196_v8 = vsel %vm183_vm0, %v179_v4, 0.0  ;;  %v440_v61 = vld.sshfl [vmem:[%s835_s1] sm:$0x33 pattern:$0x75316420]  ;;  %v351_v4 = vsub.s32 1, %v763_v18 }
 0x10b   :  { %v579_v1 = vpop.eup %578  ;;  %v193_v2 = vsel %vm183_vm0, %v178_v62, 0.0  ;;  %v182_v7 = vmul.f32 %v577_v63, %v439_v50  ;;  %v292_v59 = vunpack.c.0.s8 %v291_v58  ;;  %v289_v63 = vcombine.high %v440_v61, %v440_v61  ;;  %s610_s1 = smov [#allocation2]  }
 0x10c   :  { %185 = vadd.xlane.f32.xlu0 %v184_v3  ;;  %v181_v5 = vmul.f32 %v579_v1, %v439_v50  ;;  %v190_v6 = vsel %vm183_vm0, %v177_v0, 0.0  ;;  %s427_s24 = sshll.u32 %s610_s1, 4  ;;  %s428_s24 = int_to_ptr.vmem [resolvable:$true] %s427_s24 }
 0x10d   :  { %194 = vadd.xlane.f32.xlu1 %v193_v2  ;;  %v205_v12 = vsel %vm183_vm0, %v182_v7, 0.0  ;;  %v295_v60 = vsub.s32 %v292_v59, %v763_v18  ;;  %s584_s25 = scalar_lea.vmem %s428_s24, 1024  ;;  %p589_p1 = scmp.lt.s32.totalorder %s428_s24, %s428_s24 }
 0x10e   :  { %v202_v11 = vsel %vm183_vm0, %v181_v5, 0.0  ;;  %v311_v5 = vsub.s32 0, %v763_v18  ;;  %p585_p0 = scmp.ne.s32.totalorder %s428_s24, %s584_s25  ;;  %p590_p2 = scmp.lt.s32.totalorder %s584_s25, %s584_s25 }
 0x10f   :  { %v296_v62 = vrot.slane %v440_v61, %v295_v60  ;;  %v303_v0 = vrot.slane %v289_v63, %v295_v60 }
 0x110   :  { %197 = vadd.xlane.f32.xlu0 %v196_v8  ;;  %p591_p3 = por %p590_p2, %p589_p1 }
 0x111   :  { %191 = vadd.xlane.f32.xlu1 %v190_v6  ;;  %v304_v1 = vcombine.high %v296_v62, %v296_v62  ;;  %v305_v2 = vcombine.high %v303_v0, %v303_v0 }
 0x112   :  { %p592_p4 = pnand %p591_p3, %p585_p0 }
 0x114   :  { %203 = vadd.xlane.f32.xlu0 %v202_v11 }
 0x115   :  { %206 = vadd.xlane.f32.xlu1 %v205_v12  ;;  %v362_v12 = vsub.s32 2, %v763_v18 }
 0x12a   :  { %213 = vperm.xlu0 %562, %v208_v13  }
 0x195   :  { %v189_v16 = vpop.xlane.xlu0 %188 }
 0x196   :  { %v201_v17 = vpop.xlane.xlu1 %200  ;;  %v232_v38 = vrot.slane %v189_v16, %v231_v22 }
 0x197   :  { %v251_v42 = vrot.slane %v201_v17, %v231_v22 }
 0x199   :  { %v186_v20 = vpop.xlane.xlu0 %185 }
 0x19a   :  { %v195_v21 = vpop.xlane.xlu1 %194  ;;  %v227_v34 = vrot.slane %v186_v20, %v226_v23 }
 0x19b   :  { %v242_v32 = vrot.slane %v195_v21, %v231_v22 }
 0x19c   :  { %v234_v43 = vsel %vm233_vm1, %v232_v38, %v227_v34 }
 0x19d   :  { %v198_v24 = vpop.xlane.xlu0 %197 }
 0x19e   :  { %v192_v25 = vpop.xlane.xlu1 %191  ;;  %v247_v36 = vrot.slane %v198_v24, %v226_v23 }
 0x19f   :  { %v238_v33 = vrot.slane %v192_v25, %v226_v23 }
 0x1a0   :  { %v252_v44 = vsel %vm233_vm1, %v251_v42, %v247_v36 }
 0x1a1   :  { %v204_v35 = vpop.xlane.xlu0 %203  ;;  %v243_v39 = vsel %vm233_vm1, %v242_v32, %v238_v33 }
 0x1a2   :  { %v207_v37 = vpop.xlane.xlu1 %206  ;;  %v256_v41 = vrot.slane %v204_v35, %v226_v23  ;;  %v263_v45 = vsel %vm262_vm2, %v243_v39, %v234_v43 }
 0x1a3   :  { %v260_v40 = vrot.slane %v207_v37, %v231_v22  ;;  %v265_v48 = vsel %vm264_vm3, %v252_v44, %v263_v45 }
 0x1a5   :  { %v261_v46 = vsel %vm233_vm1, %v260_v40, %v256_v41 }
 0x1a6   :  { %v267_v49 = vsel %vm266_vm4, %v261_v46, %v265_v48 }
 0x1a9   :  { %v214_v47 = vpop.permute.xlu0 %213 }
 0x1aa   :  { %vm215_vm6 = vcmp.lt.s32.totalorder %v761_v15, %v214_v47 }
 0x1ab   :  { %v269_v50 = vsel %vm215_vm6, %v267_v49, -1e+09 }
 0x1ac   :  { %v271_v51 = vsel %vm270_vm5, %v269_v50, -inf }
 0x1ad   :  { %272 = vmax.xlane.f32.xlu1 %v271_v51 }
 0x23a   :  { %v273_v52 = vpop.xlane.xlu1 %272 }
 0x23b   :  { %v274_v53 = vsub.f32 %v269_v50, %v273_v52 }
 0x23d   :  { %v275_v54 = vmul.f32 1.442695, %v274_v53 }
 0x23f   :  { %580 = vpow2.f32 %v275_v54 }
 0x249   :  { %v581_v55 = vpop.eup %580 }
 0x24a   :  { %v277_v56 = vsel %vm270_vm5, %v581_v55, 0.0 }
 0x24b   :  { %278 = vadd.xlane.f32.xlu1 %v277_v56 }
 0x25c   :  { %307 = vperm.xlu1 %563, %v296_v62  }
 0x260   :  { %314 = vperm.xlu1 %563, %v303_v0  }
 0x264   :  { %321 = vperm.xlu1 %563, %v304_v1  }
 0x268   :  { %328 = vperm.xlu1 %563, %v305_v2  }
 0x2d8   :  { %v279_v3 = vpop.xlane.xlu1 %278 }
 0x2d9   :  { %582 = vrcp.f32 %v279_v3 }
 0x2dc   :  { %v308_v17 = vpop.permute.xlu1 %307 }
 0x2dd   :  { %v312_v21 = vrot.slane %v308_v17, %v311_v5 }
 0x2df   :  { %vm784_vm8 = vcmp.eq.s32.totalorder %v761_v15, %v312_v21 }
 0x2e0   :  { %v315_v19 = vpop.permute.xlu1 %314 }
 0x2e1   :  { %v319_v22 = vrot.slane %v315_v19, %v311_v5 }
 0x2e3   :  { %v583_v6 = vpop.eup %582  ;;  %vm779_vm7 = vcmp.eq.s32.totalorder %v761_v15, %v319_v22 }
 0x2e4   :  { %v281_v7 = vmul.f32 %v583_v6, %v581_v55  ;;  %v322_v20 = vpop.permute.xlu1 %321 }
 0x2e5   :  { %v326_v24 = vrot.slane %v322_v20, %v311_v5 }
 0x2e6   :  { %v352_v8 = vrot.slane %v281_v7, %v351_v4  ;;  %v341_v11 = vrot.slane %v281_v7, %v311_v5  ;;  %v363_v13 = vrot.slane %v281_v7, %v362_v12  ;;  %v374_v16 = vrot.slane %v281_v7, %v373_v14 }
 0x2e7   :  { %vm795_vm9 = vcmp.eq.s32.totalorder %v761_v15, %v326_v24 }
 0x2e8   :  { %354 = vbcast.lane.b32.xlu0 %v352_v8, 256  ;;  %343 = vbcast.lane.b32.xlu1 %v341_v11, 256  ;;  %v329_v23 = vpop.permute.xlu1 %328 }
 0x2e9   :  { %v333_v38 = vrot.slane %v329_v23, %v311_v5 }
 0x2eb   :  { %vm806_vm10 = vcmp.eq.s32.totalorder %v761_v15, %v333_v38 }
 0x2ec   :  { %365 = vbcast.lane.b32.xlu0 %v363_v13, 256  ;;  %347 = vbcast.lane.b32.xlu1 %v341_v11, 264 }
 0x2f0   :  { %376 = vbcast.lane.b32.xlu0 %v374_v16, 256  ;;  %358 = vbcast.lane.b32.xlu1 %v352_v8, 264 }
 0x2f4   :  { %369 = vbcast.lane.b32.xlu1 %v363_v13, 264 }
 0x2f8   :  { %380 = vbcast.lane.b32.xlu1 %v374_v16, 264 }
 0x35a   :  { %v355_v25 = vpop.permute.xlu0 %354  ;;  %v344_v33 = vpop.permute.xlu1 %343 }
 0x35b   :  { %v392_v34 = vsel %vm779_vm7, %v355_v25, 0.0  ;;  %v390_v35 = vsel %vm784_vm8, %v344_v33, 0.0 }
 0x35c   :  { %v400_v36 = vadd.f32 %v392_v34, %v721_v28  ;;  %v398_v37 = vadd.f32 %v390_v35, %v669_v9 }
 0x35e   :  { %v408_v39 = vmin.f32 %v400_v36, 1.0  ;;  %v406_v40 = vmin.f32 %v398_v37, 1.0  ;;  %v366_v41 = vpop.permute.xlu0 %365  ;;  %v348_v43 = vpop.permute.xlu1 %347 }
 0x35f   :  { %v394_v44 = vsel %vm795_vm9, %v366_v41, 0.0  ;;  %v391_v45 = vsel %vm784_vm8, %v348_v43, 0.0 }
 0x360   :  { %416 = vst [vmem:[#allocation2 + $0x10] sm:$0xff] %v408_v39  ;;  %414 = vst [vmem:[#allocation2] sm:$0xff] %v406_v40  ;;  %v402_v9 = vadd.f32 %v394_v44, %v674_v10  ;;  %v399_v28 = vadd.f32 %v391_v45, %v711_v26 }
 0x362   :  { %v410_v46 = vmin.f32 %v402_v9, 1.0  ;;  %v407_v47 = vmin.f32 %v399_v28, 1.0  ;;  %v377_v48 = vpop.permute.xlu0 %376  ;;  %v359_v50 = vpop.permute.xlu1 %358 }
 0x363   :  { %v396_v51 = vsel %vm806_vm10, %v377_v48, 0.0  ;;  %v393_v52 = vsel %vm779_vm7, %v359_v50, 0.0 }
 0x364   :  { %418 = vst [vmem:[#allocation2 + $0x20] sm:$0xff] %v410_v46  ;;  %415 = vst [vmem:[#allocation2 + $0x8] sm:$0xff] %v407_v47  ;;  %v404_v10 = vadd.f32 %v396_v51, %v726_v29  ;;  %v401_v26 = vadd.f32 %v393_v52, %v734_v30 }
 0x366   :  { %v412_v53 = vmin.f32 %v404_v10, 1.0  ;;  %v409_v54 = vmin.f32 %v401_v26, 1.0  ;;  %v370_v55 = vpop.permute.xlu1 %369 }
 0x367   :  { %v395_v15 = vsel %vm795_vm9, %v370_v55, 0.0 }
 0x368   :  { %420 = vst [vmem:[#allocation2 + $0x30] sm:$0xff] %v412_v53  ;;  %417 = vst [vmem:[#allocation2 + $0x18] sm:$0xff] %v409_v54  ;;  %v403_v56 = vadd.f32 %v395_v15, %v716_v27 }
 0x36a   :  { %v411_v57 = vmin.f32 %v403_v56, 1.0  ;;  %v381_v58 = vpop.permute.xlu1 %380 }
 0x36b   :  { %v397_v59 = vsel %vm806_vm10, %v381_v58, 0.0 }
 0x36c   :  { %419 = vst [vmem:[#allocation2 + $0x28] sm:$0xff] %v411_v57  ;;  %v405_v29 = vadd.f32 %v397_v59, %v740_v31 }
 0x36e   :  { %v413_v30 = vmin.f32 %v405_v29, 1.0 }
 0x370   :  { %421 = vst [vmem:[#allocation2 + $0x38] sm:$0xff] %v413_v30 }
 0x371   :  { %595 = shalt.err (!%p592_p4)
}
 0x372   :  { %s596_s28 = scalar_lea.hbm %s840_s6, 1024 }
 0x373   :  { %p597_p5 = scmp.ne.s32.totalorder %s840_s6, %s596_s28  ;;  %p600_p6 = scmp.lt.u32.totalorder %s596_s28, %s840_s6 }
 0x375   :  { %p602_p7 = pnand %p600_p6, %p597_p5 }
 0x377   :  { %605 = shalt.err (!%p602_p7)
}
 0x378   :  { %s611_s9 = smov 128   ;;  %s612_s10 = smov 8  }
 0x379   :  { %433 = dma.vmem_to_hbm [thread:$0]  %s428_s24, 1024, %s840_s6, [#allocation3], %s611_s9, %s611_s9, %s612_s10  }
 0x37a   :  { %606 = dma.done.wait [#allocation3], 1024  }
 0x37b   :  { %607 = vsyncadd [#allocation3], 4294966272 }
 0x37c   :  { %437 = vsyncpa [#allocation3], 1 }

</bundles_post_ra>
